<compile_context>
chip_gen: v7x
topology: tpu7x:2x2x1
jax: 0.10.0
libtpu: 0.0.40
codegen_flags: <defaults>
</compile_context>

<pallas_src>
import jax
import jax.numpy as jnp
from jax.experimental import pallas as pl
from jax.experimental.pallas import tpu as pltpu


# ----------------------------------------------------------------------------
# Fused per-graph kernel: RGCN stack + mean/head/tail pooling + rel emb + fc
# ----------------------------------------------------------------------------
def fused_graph_kernel(avcat_ref, invdeg_ref, h0_ref, wstack_ref, b_ref,
                       sel_ref, pscale_ref, wsel_ref, rel_ref, wr_ref,
                       fcb_ref, o_ref):
    ng, d = h0_ref.shape                       # nodes of this graph, emb dim
    num_layers = wstack_ref.shape[0]
    r1 = avcat_ref.shape[0] // ng              # num_rels + 1 (identity block last)

    avcat = avcat_ref[...]                     # [(R+1)*Ng, Ng]  bf16, BINARY
    invdeg = invdeg_ref[...]                   # [(R+1)*Ng, 1]   f32 (1.0 for identity)
    sel = sel_ref[...]                         # [3, Ng]         bf16, BINARY
    pscale = pscale_ref[...]                   # [3, 1]          f32 (1/count, 1, 1)
    h = h0_ref[...]                            # [Ng, D]         bf16

    fc_vec = jnp.zeros((1, d), jnp.float32)    # per-layer fc contributions (lane vec)

    for l in range(num_layers):                # static unroll (L known at trace time)
        # (1) neighbor aggregation over ALL relations + self identity: one matmul
        m = jnp.dot(avcat, h, preferred_element_type=jnp.float32)      # [(R+1)Ng, D]
        # exact binary matmul; degree normalization applied here in f32 (VPU, free)
        m = (m * invdeg).astype(jnp.bfloat16)
        # (2) relayout to lane-dense [Ng, (R+1)*D]: sublane-aligned slices +
        #     minor-dim concatenation (no HBM traffic, single relayout per layer)
        m2 = jnp.concatenate([m[r * ng:(r + 1) * ng, :] for r in range(r1)], axis=1)
        # (3) ONE transform matmul against row-stacked [W_0..W_{R-1}, W_self]:
        #     K = (R+1)*D  (>=128) instead of R+1 small K=D dots
        acc = jnp.dot(m2, wstack_ref[l], preferred_element_type=jnp.float32)  # [Ng, D]
        h_f32 = jnp.maximum(acc + b_ref[l], 0.0)
        h = h_f32.astype(jnp.bfloat16)

        # (4) classifier contribution of this layer's repr (mean / head / tail rows)
        pooled = jnp.dot(sel, h, preferred_element_type=jnp.float32)   # [3, D]
        pooled = pooled * pscale                                       # mean scaled in f32
        fc_vec = fc_vec + jnp.sum(pooled * wsel_ref[l], axis=0, keepdims=True)

    logit = jnp.sum(fc_vec, axis=1, keepdims=True)                     # [1, 1]
    logit = logit + jnp.sum(rel_ref[...] * wr_ref[...], axis=1, keepdims=True)
    logit = logit + fcb_ref[...]
    # lane-dense store (128-wide unmasked vst); wrapper takes lane 0
    o_ref[...] = jnp.broadcast_to(logit, o_ref.shape)


# ----------------------------------------------------------------------------
# Wrapper: layout prep (plain JAX glue) + one pallas_call, grid over graphs
# ----------------------------------------------------------------------------
def graph_classifier_forward(params, adj, node_feat, node_graph, node_id,
                             rel_labels, num_graphs):
    """adj: [R, N, N] BINARY block-diagonal adjacency (normalization done here in f32)."""
    L = len(params["rgcn_w"])
    R, N, _ = adj.shape
    D = node_feat.shape[1]
    B = num_graphs
    assert N % B == 0, "equal-sized contiguous graphs assumed (see TODO)"
    Ng = N // B
    R1 = R + 1
    rel_table = params["rel_table"]
    rdim = rel_table.shape[1]

    # --- block-diagonal exploitation: per-graph diagonal adjacency blocks ---
    bidx = jnp.arange(B)
    adj_pg = adj.reshape(R, B, Ng, B, Ng)[:, bidx, :, bidx, :]        # [B, R, Ng, Ng]
    deg = jnp.maximum(adj_pg.sum(axis=-1), 1.0)                        # [B, R, Ng]
    inv = (1.0 / deg).astype(jnp.float32)
    eye = jnp.broadcast_to(jnp.eye(Ng, dtype=adj.dtype), (B, 1, Ng, Ng))
    avcat = jnp.concatenate([adj_pg, eye], axis=1)                     # [B, R+1, Ng, Ng]
    avcat = avcat.reshape(B, R1 * Ng, Ng).astype(jnp.bfloat16)         # binary -> exact
    invdeg = jnp.concatenate([inv, jnp.ones((B, 1, Ng), jnp.float32)], axis=1)
    invdeg = invdeg.reshape(B, R1 * Ng, 1)

    h0 = node_feat.reshape(B, Ng, D).astype(jnp.bfloat16)

    # --- per-layer weights, row-stacked [W_0 .. W_{R-1}, W_self] -> K=(R+1)*D ---
    wstack = jnp.stack([
        jnp.concatenate([params["rgcn_w"][l],
                         params["rgcn_wself"][l][None]], axis=0).reshape(R1 * D, D)
        for l in range(L)], axis=0).astype(jnp.bfloat16)               # [L, (R+1)*D, D]
    bias = jnp.stack(params["rgcn_b"], axis=0).astype(jnp.float32)     # [L, 1, D]

    # --- per-graph binary selectors (mean / head / tail rows) + f32 scales ---
    gid = node_graph.reshape(B, Ng)
    nid = node_id.reshape(B, Ng)
    mem = (gid == bidx[:, None]).astype(jnp.float32)                   # [B, Ng]
    head = mem * (nid == 1).astype(jnp.float32)
    tail = mem * (nid == 2).astype(jnp.float32)
    sel = jnp.stack([mem, head, tail], axis=1).astype(jnp.bfloat16)    # [B, 3, Ng]
    cnt = jnp.maximum(mem.sum(axis=-1), 1.0)
    ones = jnp.ones_like(cnt)
    pscale = jnp.stack([1.0 / cnt, ones, ones], axis=1)[..., None].astype(jnp.float32)

    # --- fc weights: per-layer [mean | head | tail] vectors, NO B replication ---
    LD = L * D
    w_flat = params["fc_w"].reshape(-1)                                # [3*LD + rdim]
    w_g, w_h, w_t, w_r = (w_flat[:LD], w_flat[LD:2 * LD],
                          w_flat[2 * LD:3 * LD], w_flat[3 * LD:])
    wsel = jnp.stack([
        jnp.stack([w_g[l * D:(l + 1) * D],
                   w_h[l * D:(l + 1) * D],
                   w_t[l * D:(l + 1) * D]], axis=0)
        for l in range(L)], axis=0).astype(jnp.float32)                # [L, 3, D]

    rel = rel_table[rel_labels].reshape(B, 1, rdim).astype(jnp.float32)  # table gather
    wr = w_r.reshape(1, rdim).astype(jnp.float32)
    fcb = params["fc_b"].reshape(1, 1).astype(jnp.float32)

    out = pl.pallas_call(
        fused_graph_kernel,
        out_shape=jax.ShapeDtypeStruct((B, 1, 128), jnp.float32),
        grid=(B,),
        in_specs=[
            pl.BlockSpec((None, R1 * Ng, Ng), lambda b: (b, 0, 0)),    # avcat
            pl.BlockSpec((None, R1 * Ng, 1), lambda b: (b, 0, 0)),     # invdeg
            pl.BlockSpec((None, Ng, D), lambda b: (b, 0, 0)),          # h0
            pl.BlockSpec((L, R1 * D, D), lambda b: (0, 0, 0)),         # wstack
            pl.BlockSpec((L, 1, D), lambda b: (0, 0, 0)),              # bias
            pl.BlockSpec((None, 3, Ng), lambda b: (b, 0, 0)),          # sel
            pl.BlockSpec((None, 3, 1), lambda b: (b, 0, 0)),           # pscale
            pl.BlockSpec((L, 3, D), lambda b: (0, 0, 0)),              # wsel
            pl.BlockSpec((None, 1, rdim), lambda b: (b, 0, 0)),        # rel emb
            pl.BlockSpec((1, rdim), lambda b: (0, 0)),                 # wr
            pl.BlockSpec((1, 1), lambda b: (0, 0)),                    # fc bias
        ],
        out_specs=pl.BlockSpec((None, 1, 128), lambda b: (b, 0, 0)),
        compiler_params=pltpu.CompilerParams(
            dimension_semantics=("parallel",),        # graphs are independent
            vmem_limit_bytes=32 * 1024 * 1024),       # explicit budget (v7x-safe)
    )(avcat, invdeg, h0, wstack, bias, sel, pscale, wsel, rel, wr, fcb)

    return out[:, 0, :1]                              # [B, 1] logits


# ----------------------------------------------------------------------------
# Plain-JAX float32 reference (for correctness check)
# ----------------------------------------------------------------------------
def reference_forward(params, adj, node_feat, node_graph, node_id,
                      rel_labels, num_graphs):
    deg = jnp.maximum(adj.sum(axis=-1, keepdims=True), 1.0)
    adj_n = adj / deg                                  # RGCN-style 1/c_{i,r}
    L = len(params["rgcn_w"])
    h = node_feat
    outs = []
    for l in range(L):
        acc = h @ params["rgcn_wself"][l]
        acc = acc + jnp.einsum("rnm,md,rde->ne", adj_n, h, params["rgcn_w"][l])
        h = jnp.maximum(acc + params["rgcn_b"][l], 0.0)
        outs.append(h)
    repr_nld = jnp.stack(outs, axis=1)
    N, _, D = repr_nld.shape
    rep = repr_nld.reshape(N, L * D)
    B = num_graphs
    member = (node_graph[None, :] == jnp.arange(B)[:, None]).astype(jnp.float32)
    g_out = (member @ rep) / member.sum(axis=1, keepdims=True)
    head = ((member * (node_id[None, :] == 1)) @ rep)
    tail = ((member * (node_id[None, :] == 2)) @ rep)
    rel = params["rel_table"][rel_labels]
    g_rep = jnp.concatenate([g_out, head, tail, rel], axis=1)
    return g_rep @ params["fc_w"].T + params["fc_b"]


# ----------------------------------------------------------------------------
if __name__ == "__main__":
    # hyper-params (mirrors params.* of the PyTorch module, add_ht_emb=True)
    NUM_RELS = 4
    EMB_DIM = 32
    REL_EMB_DIM = 32
    NUM_GCN_LAYERS = 2
    B = 2                      # graphs in the batch
    NODES_PER_GRAPH = 16
    N = B * NODES_PER_GRAPH    # 32 batched nodes

    key = jax.random.PRNGKey(0)
    ks = jax.random.split(key, 12)

    params = {
        "rgcn_w": [0.1 * jax.random.normal(ks[0], (NUM_RELS, EMB_DIM, EMB_DIM), jnp.float32),
                   0.1 * jax.random.normal(ks[1], (NUM_RELS, EMB_DIM, EMB_DIM), jnp.float32)],
        "rgcn_wself": [0.1 * jax.random.normal(ks[2], (EMB_DIM, EMB_DIM), jnp.float32),
                       0.1 * jax.random.normal(ks[3], (EMB_DIM, EMB_DIM), jnp.float32)],
        "rgcn_b": [0.1 * jax.random.normal(ks[4], (1, EMB_DIM), jnp.float32),
                   0.1 * jax.random.normal(ks[5], (1, EMB_DIM), jnp.float32)],
        "rel_table": 0.1 * jax.random.normal(ks[6], (NUM_RELS, REL_EMB_DIM), jnp.float32),
        "fc_w": 0.1 * jax.random.normal(
            ks[7], (1, 3 * NUM_GCN_LAYERS * EMB_DIM + REL_EMB_DIM), jnp.float32),
        "fc_b": 0.1 * jax.random.normal(ks[8], (1,), jnp.float32),
    }

    # synthetic batched graph: BINARY block-diagonal per-relation dense adjacency
    raw = (jax.random.uniform(ks[9], (NUM_RELS, N, N)) < 0.2).astype(jnp.float32)
    block = jnp.zeros((N, N), jnp.float32)
    for bb in range(B):
        s = bb * NODES_PER_GRAPH
        block = block.at[s:s + NODES_PER_GRAPH, s:s + NODES_PER_GRAPH].set(1.0)
    adj = raw * block[None]    # binary; degree normalization done in f32 downstream

    node_feat = 0.1 * jax.random.normal(ks[10], (N, EMB_DIM), jnp.float32)
    node_graph = jnp.repeat(jnp.arange(B, dtype=jnp.int32), NODES_PER_GRAPH)
    # node id: 1 = head entity, 2 = tail entity (one of each per graph)
    node_id = jnp.zeros((N,), jnp.int32)
    for bb in range(B):
        node_id = node_id.at[bb * NODES_PER_GRAPH].set(1)
        node_id = node_id.at[bb * NODES_PER_GRAPH + 1].set(2)
    rel_labels = jnp.array([1, 3], dtype=jnp.int32)

    fwd = jax.jit(graph_classifier_forward, static_argnums=(6,))
    out = fwd(params, adj, node_feat, node_graph, node_id, rel_labels, B)
    out = jax.block_until_ready(out)

    ref = reference_forward(params, adj, node_feat, node_graph,
                            node_id, rel_labels, B)
    assert out.shape == (B, 1)
    # bf16 MXU inputs (binary operands exact, f32 post-matmul normalization)
    # with f32 accumulation -> compare against f32 reference.
    assert jnp.allclose(out, ref, atol=2e-2, rtol=2e-2), (out, ref)
    print("KERNEL_OK")
</pallas_src>

<mosaic_0001>
module attributes {stable_mosaic.version = 11 : i64} {
  func.func @fused_graph_kernel(%arg0: i32, %arg1: memref<1x80x16xbf16, #tpu.memory_space<vmem>>, %arg2: memref<1x80x1xf32, #tpu.memory_space<vmem>>, %arg3: memref<1x16x32xbf16, #tpu.memory_space<vmem>>, %arg4: memref<2x160x32xbf16, #tpu.memory_space<vmem>>, %arg5: memref<2x1x32xf32, #tpu.memory_space<vmem>>, %arg6: memref<1x3x16xbf16, #tpu.memory_space<vmem>>, %arg7: memref<1x3x1xf32, #tpu.memory_space<vmem>>, %arg8: memref<2x3x32xf32, #tpu.memory_space<vmem>>, %arg9: memref<1x1x32xf32, #tpu.memory_space<vmem>>, %arg10: memref<1x32xf32, #tpu.memory_space<vmem>>, %arg11: memref<1x1xf32, #tpu.memory_space<vmem>>, %arg12: memref<1x1x128xf32, #tpu.memory_space<vmem>>) attributes {dimension_semantics = [#tpu.dimension_semantics<parallel>], iteration_bounds = array<i64: 2>, scalar_prefetch = 0 : i64, scratch_operands = 0 : i64, tpu.core_type = #tpu.core_type<tc>, window_params = [{transform_indices = @transform_0, window_bounds = array<i64: 1, 80, 16>}, {transform_indices = @transform_1, window_bounds = array<i64: 1, 80, 1>}, {transform_indices = @transform_2, window_bounds = array<i64: 1, 16, 32>}, {pipeline_mode = #tpu.pipeline_mode<synchronous>, transform_indices = @transform_3, window_bounds = array<i64: 2, 160, 32>}, {pipeline_mode = #tpu.pipeline_mode<synchronous>, transform_indices = @transform_4, window_bounds = array<i64: 2, 1, 32>}, {transform_indices = @transform_5, window_bounds = array<i64: 1, 3, 16>}, {transform_indices = @transform_6, window_bounds = array<i64: 1, 3, 1>}, {pipeline_mode = #tpu.pipeline_mode<synchronous>, transform_indices = @transform_7, window_bounds = array<i64: 2, 3, 32>}, {transform_indices = @transform_8, window_bounds = array<i64: 1, 1, 32>}, {pipeline_mode = #tpu.pipeline_mode<synchronous>, transform_indices = @transform_9, window_bounds = array<i64: 1, 32>}, {pipeline_mode = #tpu.pipeline_mode<synchronous>, transform_indices = @transform_10, window_bounds = array<i64: 1, 1>}, {transform_indices = @transform_11, window_bounds = array<i64: 1, 1, 128>}]} {
    %c0 = arith.constant 0 : index
    %c0_0 = arith.constant 0 : index
    %c0_1 = arith.constant 0 : index
    %0 = vector.load %arg1[%c0, %c0_0, %c0_1] : memref<1x80x16xbf16, #tpu.memory_space<vmem>>, vector<1x80x16xbf16>
    %1 = vector.shape_cast %0 : vector<1x80x16xbf16> to vector<80x16xbf16>
    %c0_2 = arith.constant 0 : index
    %c0_3 = arith.constant 0 : index
    %c0_4 = arith.constant 0 : index
    %2 = vector.load %arg2[%c0_2, %c0_3, %c0_4] : memref<1x80x1xf32, #tpu.memory_space<vmem>>, vector<1x80x1xf32>
    %3 = vector.shape_cast %2 : vector<1x80x1xf32> to vector<80x1xf32>
    %c0_5 = arith.constant 0 : index
    %c0_6 = arith.constant 0 : index
    %c0_7 = arith.constant 0 : index
    %4 = vector.load %arg6[%c0_5, %c0_6, %c0_7] : memref<1x3x16xbf16, #tpu.memory_space<vmem>>, vector<1x3x16xbf16>
    %5 = vector.shape_cast %4 : vector<1x3x16xbf16> to vector<3x16xbf16>
    %c0_8 = arith.constant 0 : index
    %c0_9 = arith.constant 0 : index
    %c0_10 = arith.constant 0 : index
    %6 = vector.load %arg7[%c0_8, %c0_9, %c0_10] : memref<1x3x1xf32, #tpu.memory_space<vmem>>, vector<1x3x1xf32>
    %7 = vector.shape_cast %6 : vector<1x3x1xf32> to vector<3x1xf32>
    %c0_11 = arith.constant 0 : index
    %c0_12 = arith.constant 0 : index
    %c0_13 = arith.constant 0 : index
    %8 = vector.load %arg3[%c0_11, %c0_12, %c0_13] : memref<1x16x32xbf16, #tpu.memory_space<vmem>>, vector<1x16x32xbf16>
    %9 = vector.shape_cast %8 : vector<1x16x32xbf16> to vector<16x32xbf16>
    %cst = arith.constant 0.000000e+00 : f32
    %10 = vector.broadcast %cst : f32 to vector<1x32xf32>
    %cst_14 = arith.constant dense<0.000000e+00> : vector<80x32xf32>
    %11 = tpu.matmul %1, %9, %cst_14 {dimension_numbers = #tpu.dot_dimension_numbers<[1], [0], [0], [1], [0, 0, 1, 1], [], []>} : vector<80x16xbf16>, vector<16x32xbf16>, vector<80x32xf32> -> vector<80x32xf32>
    %12 = vector.broadcast %3 : vector<80x1xf32> to vector<80x32xf32>
    %13 = arith.mulf %11, %12 : vector<80x32xf32>
    %14 = arith.truncf %13 : vector<80x32xf32> to vector<80x32xbf16>
    %15 = vector.extract_strided_slice %14 {offsets = [0, 0], sizes = [16, 32], strides = [1, 1]} : vector<80x32xbf16> to vector<16x32xbf16>
    %16 = vector.extract_strided_slice %14 {offsets = [16, 0], sizes = [16, 32], strides = [1, 1]} : vector<80x32xbf16> to vector<16x32xbf16>
    %17 = vector.extract_strided_slice %14 {offsets = [32, 0], sizes = [16, 32], strides = [1, 1]} : vector<80x32xbf16> to vector<16x32xbf16>
    %18 = vector.extract_strided_slice %14 {offsets = [48, 0], sizes = [16, 32], strides = [1, 1]} : vector<80x32xbf16> to vector<16x32xbf16>
    %19 = vector.extract_strided_slice %14 {offsets = [64, 0], sizes = [16, 32], strides = [1, 1]} : vector<80x32xbf16> to vector<16x32xbf16>
    %20 = tpu.concatenate %15, %16, %17, %18, %19 in 1 : vector<16x32xbf16>, vector<16x32xbf16>, vector<16x32xbf16>, vector<16x32xbf16>, vector<16x32xbf16> -> vector<16x160xbf16>
    %c0_15 = arith.constant 0 : index
    %c0_16 = arith.constant 0 : index
    %c0_17 = arith.constant 0 : index
    %21 = vector.load %arg4[%c0_15, %c0_16, %c0_17] : memref<2x160x32xbf16, #tpu.memory_space<vmem>>, vector<1x160x32xbf16>
    %22 = vector.shape_cast %21 : vector<1x160x32xbf16> to vector<160x32xbf16>
    %cst_18 = arith.constant dense<0.000000e+00> : vector<16x32xf32>
    %23 = tpu.matmul %20, %22, %cst_18 {dimension_numbers = #tpu.dot_dimension_numbers<[1], [0], [0], [1], [0, 0, 1, 1], [], []>} : vector<16x160xbf16>, vector<160x32xbf16>, vector<16x32xf32> -> vector<16x32xf32>
    %c0_19 = arith.constant 0 : index
    %c0_20 = arith.constant 0 : index
    %c0_21 = arith.constant 0 : index
    %24 = vector.load %arg5[%c0_19, %c0_20, %c0_21] : memref<2x1x32xf32, #tpu.memory_space<vmem>>, vector<1x1x32xf32>
    %25 = vector.shape_cast %24 : vector<1x1x32xf32> to vector<1x32xf32>
    %26 = vector.broadcast %25 : vector<1x32xf32> to vector<16x32xf32>
    %27 = arith.addf %23, %26 : vector<16x32xf32>
    %cst_22 = arith.constant 0.000000e+00 : f32
    %28 = vector.broadcast %cst_22 : f32 to vector<16x32xf32>
    %29 = arith.maximumf %27, %28 : vector<16x32xf32>
    %30 = arith.truncf %29 : vector<16x32xf32> to vector<16x32xbf16>
    %cst_23 = arith.constant dense<0.000000e+00> : vector<3x32xf32>
    %31 = tpu.matmul %5, %30, %cst_23 {dimension_numbers = #tpu.dot_dimension_numbers<[1], [0], [0], [1], [0, 0, 1, 1], [], []>} : vector<3x16xbf16>, vector<16x32xbf16>, vector<3x32xf32> -> vector<3x32xf32>
    %32 = vector.broadcast %7 : vector<3x1xf32> to vector<3x32xf32>
    %33 = arith.mulf %31, %32 : vector<3x32xf32>
    %c0_24 = arith.constant 0 : index
    %c0_25 = arith.constant 0 : index
    %c0_26 = arith.constant 0 : index
    %34 = vector.load %arg8[%c0_24, %c0_25, %c0_26] : memref<2x3x32xf32, #tpu.memory_space<vmem>>, vector<1x3x32xf32>
    %35 = vector.shape_cast %34 : vector<1x3x32xf32> to vector<3x32xf32>
    %36 = arith.mulf %33, %35 : vector<3x32xf32>
    %cst_27 = arith.constant dense<0.000000e+00> : vector<32xf32>
    %37 = vector.multi_reduction <add>, %36, %cst_27 [0] : vector<3x32xf32> to vector<32xf32>
    %38 = vector.shape_cast %37 : vector<32xf32> to vector<1x32xf32>
    %39 = arith.addf %10, %38 : vector<1x32xf32>
    %cst_28 = arith.constant dense<0.000000e+00> : vector<80x32xf32>
    %40 = tpu.matmul %1, %30, %cst_28 {dimension_numbers = #tpu.dot_dimension_numbers<[1], [0], [0], [1], [0, 0, 1, 1], [], []>} : vector<80x16xbf16>, vector<16x32xbf16>, vector<80x32xf32> -> vector<80x32xf32>
    %41 = vector.broadcast %3 : vector<80x1xf32> to vector<80x32xf32>
    %42 = arith.mulf %40, %41 : vector<80x32xf32>
    %43 = arith.truncf %42 : vector<80x32xf32> to vector<80x32xbf16>
    %44 = vector.extract_strided_slice %43 {offsets = [0, 0], sizes = [16, 32], strides = [1, 1]} : vector<80x32xbf16> to vector<16x32xbf16>
    %45 = vector.extract_strided_slice %43 {offsets = [16, 0], sizes = [16, 32], strides = [1, 1]} : vector<80x32xbf16> to vector<16x32xbf16>
    %46 = vector.extract_strided_slice %43 {offsets = [32, 0], sizes = [16, 32], strides = [1, 1]} : vector<80x32xbf16> to vector<16x32xbf16>
    %47 = vector.extract_strided_slice %43 {offsets = [48, 0], sizes = [16, 32], strides = [1, 1]} : vector<80x32xbf16> to vector<16x32xbf16>
    %48 = vector.extract_strided_slice %43 {offsets = [64, 0], sizes = [16, 32], strides = [1, 1]} : vector<80x32xbf16> to vector<16x32xbf16>
    %49 = tpu.concatenate %44, %45, %46, %47, %48 in 1 : vector<16x32xbf16>, vector<16x32xbf16>, vector<16x32xbf16>, vector<16x32xbf16>, vector<16x32xbf16> -> vector<16x160xbf16>
    %c1 = arith.constant 1 : index
    %c0_29 = arith.constant 0 : index
    %c0_30 = arith.constant 0 : index
    %50 = vector.load %arg4[%c1, %c0_29, %c0_30] : memref<2x160x32xbf16, #tpu.memory_space<vmem>>, vector<1x160x32xbf16>
    %51 = vector.shape_cast %50 : vector<1x160x32xbf16> to vector<160x32xbf16>
    %cst_31 = arith.constant dense<0.000000e+00> : vector<16x32xf32>
    %52 = tpu.matmul %49, %51, %cst_31 {dimension_numbers = #tpu.dot_dimension_numbers<[1], [0], [0], [1], [0, 0, 1, 1], [], []>} : vector<16x160xbf16>, vector<160x32xbf16>, vector<16x32xf32> -> vector<16x32xf32>
    %c1_32 = arith.constant 1 : index
    %c0_33 = arith.constant 0 : index
    %c0_34 = arith.constant 0 : index
    %53 = vector.load %arg5[%c1_32, %c0_33, %c0_34] : memref<2x1x32xf32, #tpu.memory_space<vmem>>, vector<1x1x32xf32>
    %54 = vector.shape_cast %53 : vector<1x1x32xf32> to vector<1x32xf32>
    %55 = vector.broadcast %54 : vector<1x32xf32> to vector<16x32xf32>
    %56 = arith.addf %52, %55 : vector<16x32xf32>
    %cst_35 = arith.constant 0.000000e+00 : f32
    %57 = vector.broadcast %cst_35 : f32 to vector<16x32xf32>
    %58 = arith.maximumf %56, %57 : vector<16x32xf32>
    %59 = arith.truncf %58 : vector<16x32xf32> to vector<16x32xbf16>
    %cst_36 = arith.constant dense<0.000000e+00> : vector<3x32xf32>
    %60 = tpu.matmul %5, %59, %cst_36 {dimension_numbers = #tpu.dot_dimension_numbers<[1], [0], [0], [1], [0, 0, 1, 1], [], []>} : vector<3x16xbf16>, vector<16x32xbf16>, vector<3x32xf32> -> vector<3x32xf32>
    %61 = vector.broadcast %7 : vector<3x1xf32> to vector<3x32xf32>
    %62 = arith.mulf %60, %61 : vector<3x32xf32>
    %c1_37 = arith.constant 1 : index
    %c0_38 = arith.constant 0 : index
    %c0_39 = arith.constant 0 : index
    %63 = vector.load %arg8[%c1_37, %c0_38, %c0_39] : memref<2x3x32xf32, #tpu.memory_space<vmem>>, vector<1x3x32xf32>
    %64 = vector.shape_cast %63 : vector<1x3x32xf32> to vector<3x32xf32>
    %65 = arith.mulf %62, %64 : vector<3x32xf32>
    %cst_40 = arith.constant dense<0.000000e+00> : vector<32xf32>
    %66 = vector.multi_reduction <add>, %65, %cst_40 [0] : vector<3x32xf32> to vector<32xf32>
    %67 = vector.shape_cast %66 : vector<32xf32> to vector<1x32xf32>
    %68 = arith.addf %39, %67 : vector<1x32xf32>
    %cst_41 = arith.constant dense<0.000000e+00> : vector<1xf32>
    %69 = vector.multi_reduction <add>, %68, %cst_41 [1] : vector<1x32xf32> to vector<1xf32>
    %70 = vector.shape_cast %69 : vector<1xf32> to vector<1x1xf32>
    %c0_42 = arith.constant 0 : index
    %c0_43 = arith.constant 0 : index
    %c0_44 = arith.constant 0 : index
    %71 = vector.load %arg9[%c0_42, %c0_43, %c0_44] : memref<1x1x32xf32, #tpu.memory_space<vmem>>, vector<1x1x32xf32>
    %72 = vector.shape_cast %71 : vector<1x1x32xf32> to vector<1x32xf32>
    %c0_45 = arith.constant 0 : index
    %c0_46 = arith.constant 0 : index
    %73 = vector.load %arg10[%c0_45, %c0_46] : memref<1x32xf32, #tpu.memory_space<vmem>>, vector<1x32xf32>
    %74 = arith.mulf %72, %73 : vector<1x32xf32>
    %cst_47 = arith.constant dense<0.000000e+00> : vector<1xf32>
    %75 = vector.multi_reduction <add>, %74, %cst_47 [1] : vector<1x32xf32> to vector<1xf32>
    %76 = vector.shape_cast %75 : vector<1xf32> to vector<1x1xf32>
    %77 = arith.addf %70, %76 : vector<1x1xf32>
    %c0_48 = arith.constant 0 : index
    %c0_49 = arith.constant 0 : index
    %78 = vector.load %arg11[%c0_48, %c0_49] : memref<1x1xf32, #tpu.memory_space<vmem>>, vector<1x1xf32>
    %79 = arith.addf %77, %78 : vector<1x1xf32>
    %80 = vector.shape_cast %79 : vector<1x1xf32> to vector<1x1xf32>
    %81 = vector.broadcast %80 : vector<1x1xf32> to vector<1x128xf32>
    %c0_50 = arith.constant 0 : index
    %c0_51 = arith.constant 0 : index
    %c0_52 = arith.constant 0 : index
    %82 = vector.load %arg12[%c0_50, %c0_51, %c0_52] : memref<1x1x128xf32, #tpu.memory_space<vmem>>, vector<1x1x128xf32>
    %83 = vector.shape_cast %82 : vector<1x1x128xf32> to vector<1x128xf32>
    %84 = vector.shape_cast %81 : vector<1x128xf32> to vector<1x1x128xf32>
    tpu.vector_store %arg12[%c0_50, %c0_51, %c0_52], %84 {strides = array<i32>} : memref<1x1x128xf32, #tpu.memory_space<vmem>>, vector<1x1x128xf32>,
    return
  }
  func.func @transform_0(%arg0: i32) -> (i32, i32, i32) {
    %c0_i32 = arith.constant 0 : i32
    %c0_i32_0 = arith.constant 0 : i32
    %c0_i32_1 = arith.constant 0 : i32
    return %arg0, %c0_i32, %c0_i32_0 : i32, i32, i32
  }
  func.func @transform_1(%arg0: i32) -> (i32, i32, i32) {
    %c0_i32 = arith.constant 0 : i32
    %c0_i32_0 = arith.constant 0 : i32
    %c0_i32_1 = arith.constant 0 : i32
    return %arg0, %c0_i32, %c0_i32_0 : i32, i32, i32
  }
  func.func @transform_2(%arg0: i32) -> (i32, i32, i32) {
    %c0_i32 = arith.constant 0 : i32
    %c0_i32_0 = arith.constant 0 : i32
    %c0_i32_1 = arith.constant 0 : i32
    return %arg0, %c0_i32, %c0_i32_0 : i32, i32, i32
  }
  func.func @transform_3(%arg0: i32) -> (i32, i32, i32) {
    %c0_i32 = arith.constant 0 : i32
    %c0_i32_0 = arith.constant 0 : i32
    %c0_i32_1 = arith.constant 0 : i32
    %c0_i32_2 = arith.constant 0 : i32
    return %c0_i32, %c0_i32_0, %c0_i32_1 : i32, i32, i32
  }
  func.func @transform_4(%arg0: i32) -> (i32, i32, i32) {
    %c0_i32 = arith.constant 0 : i32
    %c0_i32_0 = arith.constant 0 : i32
    %c0_i32_1 = arith.constant 0 : i32
    %c0_i32_2 = arith.constant 0 : i32
    return %c0_i32, %c0_i32_0, %c0_i32_1 : i32, i32, i32
  }
  func.func @transform_5(%arg0: i32) -> (i32, i32, i32) {
    %c0_i32 = arith.constant 0 : i32
    %c0_i32_0 = arith.constant 0 : i32
    %c0_i32_1 = arith.constant 0 : i32
    return %arg0, %c0_i32, %c0_i32_0 : i32, i32, i32
  }
  func.func @transform_6(%arg0: i32) -> (i32, i32, i32) {
    %c0_i32 = arith.constant 0 : i32
    %c0_i32_0 = arith.constant 0 : i32
    %c0_i32_1 = arith.constant 0 : i32
    return %arg0, %c0_i32, %c0_i32_0 : i32, i32, i32
  }
  func.func @transform_7(%arg0: i32) -> (i32, i32, i32) {
    %c0_i32 = arith.constant 0 : i32
    %c0_i32_0 = arith.constant 0 : i32
    %c0_i32_1 = arith.constant 0 : i32
    %c0_i32_2 = arith.constant 0 : i32
    return %c0_i32, %c0_i32_0, %c0_i32_1 : i32, i32, i32
  }
  func.func @transform_8(%arg0: i32) -> (i32, i32, i32) {
    %c0_i32 = arith.constant 0 : i32
    %c0_i32_0 = arith.constant 0 : i32
    %c0_i32_1 = arith.constant 0 : i32
    return %arg0, %c0_i32, %c0_i32_0 : i32, i32, i32
  }
  func.func @transform_9(%arg0: i32) -> (i32, i32) {
    %c0_i32 = arith.constant 0 : i32
    %c0_i32_0 = arith.constant 0 : i32
    %c0_i32_1 = arith.constant 0 : i32
    return %c0_i32, %c0_i32_0 : i32, i32
  }
  func.func @transform_10(%arg0: i32) -> (i32, i32) {
    %c0_i32 = arith.constant 0 : i32
    %c0_i32_0 = arith.constant 0 : i32
    %c0_i32_1 = arith.constant 0 : i32
    return %c0_i32, %c0_i32_0 : i32, i32
  }
  func.func @transform_11(%arg0: i32) -> (i32, i32, i32) {
    %c0_i32 = arith.constant 0 : i32
    %c0_i32_0 = arith.constant 0 : i32
    %c0_i32_1 = arith.constant 0 : i32
    return %arg0, %c0_i32, %c0_i32_0 : i32, i32, i32
  }
}

</mosaic_0001>

<bundles_post_ra>
// kernel: graph_classifier_forward.1
= control target key start
LH: loop header
LB: loop body
LE: loop exit
PB: predicated region body
PF: predicated region fallthrough
CT: control target
= control target key end

     0   :  { %s1584_s19 = smov 0   ;;  %s1848_s0 = inlined_call_operand.vmem [shape: bf16[2,80,16], index: 0, kind: input, shape index: {}]   ;;  %s1849_s1 = inlined_call_operand.vmem [shape: f32[2,80,1], index: 1, kind: input, shape index: {}]   ;;  %s1850_s2 = inlined_call_operand.vmem [shape: bf16[2,16,32], index: 2, kind: input, shape index: {}]   ;;  %s1851_s3 = inlined_call_operand.vmem [shape: bf16[2,160,32], index: 3, kind: input, shape index: {}]   ;;  %s1852_s4 = inlined_call_operand.vmem [shape: f32[2,1,32], index: 4, kind: input, shape index: {}]   ;;  %s1853_s5 = inlined_call_operand.vmem [shape: bf16[2,3,16], index: 5, kind: input, shape index: {}]   ;;  %s1854_s6 = inlined_call_operand.vmem [shape: f32[2,3,1], index: 6, kind: input, shape index: {}]   ;;  %s1855_s7 = inlined_call_operand.vmem [shape: f32[2,3,32], index: 7, kind: input, shape index: {}]   ;;  %s1856_s8 = inlined_call_operand.vmem [shape: f32[2,1,32], index: 8, kind: input, shape index: {}]   ;;  %s1857_s9 = inlined_call_operand.vmem [shape: f32[1,32], index: 9, kind: input, shape index: {}]   ;;  %s1858_s10 = inlined_call_operand.<no memory space> [shape: f32[1,1], index: 10, kind: input, shape index: {}]   ;;  %s1859_s11 = inlined_call_operand.vmem [shape: f32[2,1,128], index: 11, kind: output, shape index: {}]  }
   0x1   :  { %v16_v0 = vstv %s1858_s10 }
   0x2   :  { %17 = vst [vmem:[#allocation2] sm:$0x1] %v16_v0 }
   0x3 LB: > { %s1313_s20 = sadd.s32 4294967295, %s1513_s19   ;;  %p1317_p0 = scmp.ge.s32.totalorder %s1513_s19, 1  ;;  %s1513_s19 = sphi %s1584_s19, %s23_s19  }
   0x4   : > { %p385_p1 = scmp.lt.s32.totalorder %s1513_s19, 3 }
   0x6   : > { %p386_p2 = pnand %p1317_p0, %p385_p1 }
   0x7   : > { %p444_p3 = scmp.lt.s32.totalorder (!%p386_p2), %s1313_s20, 1  ;;  %v1515_v1 = vmov (!%p386_p2), 0.0   ;;  %vm1516_vm0 = vmmov (!%p386_p2), 0   ;;  %v1517_v2 = vmov (!%p386_p2), 0   ;;  %vm529_vm1 = vcmask (!%p386_p2), 130048   ;;  %v1487_v19 = vld [vmem:[%s1851_s3] sm:$0xff] (!%p386_p2)  }
   0x8   : > { %389 = sbr.rel (%p386_p2) target bundleno = 1691 (0x69b), region = 64  ;;  %1407 = vmatprep.subr.bf16.mxu0 (!%p386_p2), %v1515_v1  ;;  %1409 = vmatprep.mubr.msk.bf16.mxu0 (!%p386_p2), %vm1516_vm0, %v1515_v1  ;;  %v1488_v20 = vld [vmem:[%s1851_s3 + $0x8] sm:$0xff] (!%p386_p2)   ;;  %v1489_v21 = vld [vmem:[%s1851_s3 + $0x10] sm:$0xff] (!%p386_p2)   ;;  %v1490_v22 = vld [vmem:[%s1851_s3 + $0x18] sm:$0xff] (!%p386_p2)   ;;  %s1518_s15 = smov (!%p386_p2), 32   ;;  %vm692_vm2 = vcmask (!%p386_p2), 261120  }
   0x9   : > { %1479 = vset.pattern.permute.xlu0 (!%p386_p2), %v1517_v2  ;;  %1480 = vset.pattern.permute.xlu1 (!%p386_p2), %v1517_v2  ;;  %v1491_v23 = vld [vmem:[%s1851_s3 + $0x20] sm:$0xff] (!%p386_p2)   ;;  %v1492_v24 = vld [vmem:[%s1851_s3 + $0x28] sm:$0xff] (!%p386_p2)   ;;  %v1493_v36 = vld [vmem:[%s1851_s3 + $0x30] sm:$0xff] (!%p386_p2)   ;;  %s1519_s16 = smov (!%p386_p2), 64   ;;  %s1520_s17 = smov (!%p386_p2), 96   ;;  %vm696_vm3 = vcmask (!%p386_p2), 523264  }
   0xa   : > { %793 = vmatprep.subr.bf16.mxu1 (!%p386_p2), %v1517_v2  ;;  %v1494_v40 = vld [vmem:[%s1851_s3 + $0x38] sm:$0xff] (!%p386_p2)   ;;  %v1495_v45 = vld [vmem:[%s1851_s3 + $0x40] sm:$0xff] (!%p386_p2)   ;;  %v1496_v49 = vld [vmem:[%s1851_s3 + $0x48] sm:$0xff] (!%p386_p2)   ;;  %vm699_vm4 = vcmask (!%p386_p2), 785408   ;;  %vm1196_vm5 = vcmask (!%p386_p2), 253952   ;;  %vm888_vm6 = vcmask (!%p386_p2), 256000  }
   0xb   : > { %794 = vmatpush1.bf16.msra.mxu1 (!%p386_p2), %v1487_v19 }
   0xc   : > { %795 = vmatprep.subr.bf16.mxu1 (!%p386_p2), %v1517_v2 }
   0xf   : > { %s1861_s20 = smov (!%p444_p3, %s1313_s20), 1  ;;  %796 = vmatpush1.bf16.msra.mxu1 %v1488_v20 }
  0x10   : > { %s1390_s10 = sshll.u32 %s1861_s20, 3  ;;  %s1463_s21 = smul.u32 40, %s1861_s20  ;;  %797 = vmatprep.subr.bf16.mxu1 %v1517_v2 }
  0x11   : > { %s458_s24 = scalar_lea.vmem %s1850_s2, %s1390_s10  ;;  %s1464_s25 = smul.u32 80, %s1861_s20 }
  0x12   : > { %v1481_v3 = vld [vmem:[%s458_s24] sm:$0xff]   ;;  %s1609_s28 = scalar_lea.vmem %s1848_s0, %s1463_s21  ;;  %s1322_s21 = sshll.u32 %s1861_s20, 1 }
  0x13   : > { %v1612_v4 = vld [vmem:[%s1609_s28] sm:$0xff]   ;;  %1408 = vmatpush3.bf16.msra.mxu0 %v1481_v3  ;;  %s453_s12 = scalar_lea.vmem %s1849_s1, %s1464_s25  ;;  %v1623_v9 = vld [vmem:[%s1609_s28 + $0x8] sm:$0xff]   ;;  %v1630_v14 = vld [vmem:[%s1609_s28 + $0x10] sm:$0xff]   ;;  %798 = vmatpush1.bf16.msra.mxu1 %v1489_v21  ;;  %s462_s24 = scalar_lea.vmem %s1853_s5, %s1322_s21 }
  0x14   : > { %1429 = vmatprep.subr.bf16.mxu0 %v1515_v1  ;;  %v486_v5 = vld [vmem:[%s453_s12 + $0x10] sm:$0xff]  ;;  %v488_v6 = vld [vmem:[%s453_s12 + $0x20] sm:$0xff]  ;;  %v487_v7 = vld [vmem:[%s453_s12 + $0x18] sm:$0xff]  ;;  %799 = vmatprep.subr.bf16.mxu1 %v1517_v2  ;;  %s1323_s30 = sshll.u32 %s1861_s20, 2  ;;  %s469_s10 = scalar_lea.vmem %s1856_s8, %s1861_s20 }
  0x15   : > { %630 = vperm.xlu0 %1479, %v486_v5   ;;  %640 = vperm.xlu1 %1480, %v488_v6   ;;  %v489_v8 = vld [vmem:[%s453_s12 + $0x28] sm:$0xff]  ;;  %v490_v10 = vld [vmem:[%s453_s12 + $0x30] sm:$0xff]  ;;  %v491_v11 = vld [vmem:[%s453_s12 + $0x38] sm:$0xff]  ;;  %s466_s14 = scalar_lea.vmem %s1854_s6, %s1323_s30  ;;  %s472_s29 = scalar_lea.vmem %s1859_s11, %s1861_s20 }
  0x16   : > { %1410 = vmatmul.mubr.msk.bf16.vlgmr.msra.gmra.mrb[0].mxu0 %vm529_vm1, %v1612_v4  ;;  %v484_v12 = vld [vmem:[%s453_s12] sm:$0xff]  ;;  %v485_v13 = vld [vmem:[%s453_s12 + $0x8] sm:$0xff]  ;;  %v1637_v17 = vld [vmem:[%s1609_s28 + $0x18] sm:$0xff]  }
  0x17   : > { %1413 = vmatprep.mubr.msk.bf16.mxu0 %vm1516_vm0, %v1515_v1  ;;  %v493_v15 = vld [vmem:[%s453_s12 + $0x48] sm:$0xff]  ;;  %v492_v16 = vld [vmem:[%s453_s12 + $0x40] sm:$0xff]  ;;  %800 = vmatpush1.bf16.msra.mxu1 %v1490_v22 }
  0x18   : > { %v1644_v18 = vld [vmem:[%s1609_s28 + $0x20] sm:$0xff]   ;;  %801 = vmatprep.subr.bf16.mxu1 %v1517_v2 }
  0x19   : > { %635 = vperm.xlu0 %1479, %v487_v7   ;;  %645 = vperm.xlu1 %1480, %v489_v8  }
  0x1b   : > { %802 = vmatpush1.bf16.msra.mxu1 %v1491_v23  ;;  %v1335_v23 = vld [vmem:[%s1852_s4] ss:$0 sm:$0xff] }
  0x1c   : > { %803 = vmatprep.subr.bf16.mxu1 %v1517_v2 }
  0x1d   : > { %650 = vperm.xlu0 %1479, %v490_v10   ;;  %655 = vperm.xlu1 %1480, %v491_v11  }
  0x1e   : > { %1414 = vmatmul.mubr.msk.bf16.gmra.mrb[4].mxu0 %vm529_vm1, %v1623_v9 }
  0x1f   : > { %1417 = vmatprep.mubr.msk.bf16.mxu0 %vm1516_vm0, %v1515_v1  ;;  %804 = vmatpush1.bf16.msra.mxu1 %v1492_v24 }
  0x20   : > { %805 = vmatprep.subr.bf16.mxu1 %v1517_v2 }
  0x21   : > { %620 = vperm.xlu0 %1479, %v484_v12   ;;  %625 = vperm.xlu1 %1480, %v485_v13  }
  0x23   : > { %806 = vmatpush1.bf16.msra.mxu1 %v1493_v36 }
  0x24   : > { %807 = vmatprep.subr.bf16.mxu1 %v1517_v2 }
  0x25   : > { %665 = vperm.xlu1 %1480, %v493_v15   ;;  %660 = vperm.xlu0 %1479, %v492_v16  }
  0x26   : > { %1418 = vmatmul.mubr.msk.bf16.gmra.mrb[8].mxu0 %vm529_vm1, %v1630_v14 }
  0x27   : > { %1421 = vmatprep.mubr.msk.bf16.mxu0 %vm1516_vm0, %v1515_v1  ;;  %808 = vmatpush1.bf16.msra.mxu1 %v1494_v40 }
  0x28   : > { %809 = vmatprep.subr.bf16.mxu1 %v1517_v2 }
  0x2b   : > { %810 = vmatpush1.bf16.msra.mxu1 %v1495_v45  ;;  %v1503_v45 = vld [vmem:[%s1851_s3 + $0x80] sm:$0xff]  }
  0x2c   : > { %811 = vmatprep.subr.bf16.mxu1 %v1517_v2 }
  0x2e   : > { %1422 = vmatmul.mubr.msk.bf16.gmra.mrb[12].mxu0 %vm529_vm1, %v1637_v17 }
  0x2f   : > { %1425 = vmatprep.mubr.msk.bf16.mxu0 %vm1516_vm0, %v1515_v1  ;;  %812 = vmatpush1.bf16.msra.mxu1 %v1496_v49  ;;  %v1504_v49 = vld [vmem:[%s1851_s3 + $0x88] sm:$0xff]  }
  0x30   : > { %1435 = vmatprep.subr.bf16.mxu1 %v1515_v1 }
  0x36   : > { %1426 = vmatmul.mubr.msk.bf16.gmra.mrb[16].mxu0 %vm529_vm1, %v1644_v18 }
  0x37   : > { %1431 = vmatprep.mubr.msk.bf16.mxu0 %vm1516_vm0, %v1515_v1 }
  0x94   : > { %v1674_v25 = vpop.permute.xlu0 %630  ;;  %v1676_v26 = vpop.permute.xlu1 %640 }
  0x98   : > { %v1678_v27 = vpop.permute.xlu0 %635  ;;  %v1680_v28 = vpop.permute.xlu1 %645 }
  0x9c   : > { %v1682_v29 = vpop.permute.xlu0 %650  ;;  %v1684_v30 = vpop.permute.xlu1 %655 }
  0xa0   : > { %v1686_v31 = vpop.permute.xlu0 %620  ;;  %v1688_v33 = vpop.permute.xlu1 %625 }
  0xa4   : > { %v1717_v5 = vpop.permute.xlu1 %665  ;;  %v1719_v7 = vpop.permute.xlu0 %660 }
  0xe9   : > { %v579_v32 = vpop.f32.mrb[0].mxu0 }
  0xea   : > { %v1411_v34 = vpop.f32.mrb[1].mxu0  ;;  %v668_v37 = vmul.f32 %v1686_v31, %v579_v32 }
  0xeb   : > { %v582_v35 = vpop.f32.mrb[2].mxu0 }
  0xec   : > { %v669_v38 = vmul.f32 %v1688_v33, %v582_v35  ;;  %v1412_v39 = vpop.f32.mrb[3].mxu0 }
  0xee   : > { %v678_v41 = vpack.c.bf16 %v669_v38, %v668_v37 }
  0xf1   : > { %v587_v42 = vpop.f32.mrb[4].mxu0 }
  0xf2   : > { %v1415_v43 = vpop.f32.mrb[5].mxu0  ;;  %v670_v46 = vmul.f32 %v1674_v25, %v587_v42 }
  0xf3   : > { %v590_v44 = vpop.f32.mrb[6].mxu0 }
  0xf4   : > { %v671_v47 = vmul.f32 %v1678_v27, %v590_v44  ;;  %v1416_v48 = vpop.f32.mrb[7].mxu0 }
  0xf6   : > { %v679_v50 = vpack.c.bf16 %v671_v47, %v670_v46 }
  0xf8   : > { %684 = vrot.lane.b32.xlu0 %v679_v50, %s1518_s15 }
  0xf9   : > { %v595_v51 = vpop.f32.mrb[8].mxu0 }
  0xfa   : > { %v1419_v52 = vpop.f32.mrb[9].mxu0  ;;  %v672_v54 = vmul.f32 %v1676_v26, %v595_v51 }
  0xfb   : > { %v598_v53 = vpop.f32.mrb[10].mxu0 }
  0xfc   : > { %v673_v55 = vmul.f32 %v1680_v28, %v598_v53  ;;  %v1420_v56 = vpop.f32.mrb[11].mxu0 }
  0xfd   : > { %v1506_v56 = vld [vmem:[%s1851_s3 + $0x98] sm:$0xff]  }
  0xfe   : > { %v680_v57 = vpack.c.bf16 %v673_v55, %v672_v54 }
 0x100   : > { %687 = vrot.lane.b32.xlu1 %v680_v57, %s1519_s16 }
 0x101   : > { %v603_v58 = vpop.f32.mrb[12].mxu0 }
 0x102   : > { %v1423_v59 = vpop.f32.mrb[13].mxu0  ;;  %v674_v61 = vmul.f32 %v1682_v29, %v603_v58 }
 0x103   : > { %v606_v60 = vpop.f32.mrb[14].mxu0 }
 0x104   : > { %v675_v62 = vmul.f32 %v1684_v30, %v606_v60  ;;  %v1424_v63 = vpop.f32.mrb[15].mxu0 }
 0x105   : > { %v495_v63 = vld [vmem:[%s466_s14] sm:$0x7] }
 0x106   : > { %v681_v0 = vpack.c.bf16 %v675_v62, %v674_v61 }
 0x108   : > { %690 = vrot.lane.b32.xlu0 %v681_v0, %s1520_s17 }
 0x109   : > { %v611_v3 = vpop.f32.mrb[16].mxu0 }
 0x10a   : > { %v1427_v6 = vpop.f32.mrb[17].mxu0  ;;  %v676_v10 = vmul.f32 %v1719_v7, %v611_v3 }
 0x10b   : > { %v614_v8 = vpop.f32.mrb[18].mxu0 }
 0x10c   : > { %v677_v11 = vmul.f32 %v1717_v5, %v614_v8  ;;  %v1428_v12 = vpop.f32.mrb[19].mxu0 }
 0x10e   : > { %v682_v13 = vpack.c.bf16 %v677_v11, %v676_v10 }
 0x110   : > { %1346 = vmatprep.mubr.msk.bf16.mxu1 %vm692_vm2, %v682_v13 }
 0x16a   : > { %v685_v15 = vpop.permute.xlu0 %684 }
 0x16b   : > { %v695_v19 = vsel %vm692_vm2, %v678_v41, %v685_v15  ;;  %v1736_v41 = vld [vmem:[%s462_s24] sm:$0x3] }
 0x172   : > { %v688_v16 = vpop.permute.xlu1 %687 }
 0x173   : > { %v698_v20 = vsel %vm696_vm3, %v695_v19, %v688_v16 }
 0x17a   : > { %v691_v21 = vpop.permute.xlu0 %690 }
 0x17b   : > { %v701_v22 = vsel %vm699_vm4, %v698_v20, %v691_v21 }
 0x17c   : > { %826 = vmatmul.mubr.bf16.vlgmr.msra.gmra.mrb[0].mxu1 %v701_v22 }
 0x17d   : > { %1437 = vmatprep.mubr.msk.bf16.mxu1 %vm1516_vm0, %v1515_v1 }
 0x24f   : > { %v827_v24 = vpop.f32.mrb[0].mxu1 }
 0x250   : > { %v828_v32 = vadd.f32 %v1335_v23, %v827_v24  ;;  %v829_v34 = vpop.f32.mrb[1].mxu1 }
 0x251   : > { %v830_v35 = vpop.f32.mrb[2].mxu1 }
 0x252   : > { %v831_v36 = vadd.f32 %v1335_v23, %v830_v35  ;;  %v832_v37 = vpop.f32.mrb[3].mxu1  ;;  %v834_v38 = vmax.f32 %v828_v32, 0.0 }
 0x254   : > { %v835_v39 = vmax.f32 %v831_v36, 0.0 }
 0x256   : > { %v836_v40 = vpack.c.bf16 %v835_v39, %v834_v38 }
 0x258   : > { %1430 = vmatpush3.bf16.msra.mxu0 %v836_v40  ;;  %1436 = vmatpush3.bf16.msra.mxu1 %v836_v40 }
 0x259   : > { %1094 = vmatprep.subr.bf16.mxu0 %v1517_v2  ;;  %1457 = vmatprep.subr.bf16.mxu1 %v1515_v1 }
 0x25b   : > { %1438 = vmatmul.mubr.msk.bf16.vlgmr.msra.gmra.mrb[4].mxu1 %vm529_vm1, %v1612_v4  ;;  %1432 = vmatmul.mubr.msk.bf16.vlgmr.msra.gmra.mrb[20].mxu0 %vm529_vm1, %v1736_v41  ;;  %v1497_v4 = vld [vmem:[%s1851_s3 + $0x50] sm:$0xff]  }
 0x25c   : > { %1441 = vmatprep.mubr.msk.bf16.mxu1 %vm1516_vm0, %v1515_v1  ;;  %1095 = vmatpush1.bf16.msra.mxu0 %v1497_v4 }
 0x25d   : > { %1096 = vmatprep.subr.bf16.mxu0 %v1517_v2 }
 0x263   : > { %1442 = vmatmul.mubr.msk.bf16.gmra.mrb[8].mxu1 %vm529_vm1, %v1623_v9  ;;  %v1498_v9 = vld [vmem:[%s1851_s3 + $0x58] sm:$0xff]  }
 0x264   : > { %1445 = vmatprep.mubr.msk.bf16.mxu1 %vm1516_vm0, %v1515_v1  ;;  %1097 = vmatpush1.bf16.msra.mxu0 %v1498_v9 }
 0x265   : > { %1098 = vmatprep.subr.bf16.mxu0 %v1517_v2 }
 0x26b   : > { %1446 = vmatmul.mubr.msk.bf16.gmra.mrb[12].mxu1 %vm529_vm1, %v1630_v14  ;;  %v1499_v14 = vld [vmem:[%s1851_s3 + $0x60] sm:$0xff]  }
 0x26c   : > { %1449 = vmatprep.mubr.msk.bf16.mxu1 %vm1516_vm0, %v1515_v1  ;;  %1099 = vmatpush1.bf16.msra.mxu0 %v1499_v14 }
 0x26d   : > { %1100 = vmatprep.subr.bf16.mxu0 %v1517_v2 }
 0x273   : > { %1450 = vmatmul.mubr.msk.bf16.gmra.mrb[16].mxu1 %vm529_vm1, %v1637_v17  ;;  %v1501_v17 = vld [vmem:[%s1851_s3 + $0x70] sm:$0xff]  }
 0x274   : > { %1453 = vmatprep.mubr.msk.bf16.mxu1 %vm1516_vm0, %v1515_v1 }
 0x27b   : > { %1454 = vmatmul.mubr.msk.bf16.gmra.mrb[20].mxu1 %vm529_vm1, %v1644_v18  ;;  %v1502_v18 = vld [vmem:[%s1851_s3 + $0x78] sm:$0xff]  }
 0x27c   : > { %1459 = vmatprep.mubr.msk.bf16.mxu1 %vm1516_vm0, %v1515_v1  ;;  %v1500_v1 = vld [vmem:[%s1851_s3 + $0x68] sm:$0xff]  }
 0x27d   : > { %1101 = vmatpush1.bf16.msra.mxu0 %v1500_v1  ;;  %v1194_v1 = vld [vmem:[%s1857_s9] sm:$0x1] }
 0x27e   : > { %1102 = vmatprep.subr.bf16.mxu0 %v1517_v2 }
 0x281   : > { %1103 = vmatpush1.bf16.msra.mxu0 %v1501_v17  ;;  %v1193_v17 = vld [vmem:[%s469_s10] sm:$0x1] }
 0x282   : > { %1104 = vmatprep.subr.bf16.mxu0 %v1517_v2 }
 0x285   : > { %1105 = vmatpush1.bf16.msra.mxu0 %v1502_v18  ;;  %v1195_v18 = vmul.f32 %v1194_v1, %v1193_v17 }
 0x286   : > { %1106 = vmatprep.subr.bf16.mxu0 %v1517_v2 }
 0x289   : > { %1107 = vmatpush1.bf16.msra.mxu0 %v1503_v45  ;;  %v886_v45 = vld [vmem:[%s1855_s7] sm:$0x7] }
 0x28a   : > { %1108 = vmatprep.subr.bf16.mxu0 %v1517_v2 }
 0x28d   : > { %1109 = vmatpush1.bf16.msra.mxu0 %v1504_v49 }
 0x28e   : > { %1110 = vmatprep.subr.bf16.mxu0 %v1517_v2 }
 0x32e   : > { %v931_v42 = vpop.f32.mrb[4].mxu1  ;;  %v874_v6 = vpop.f32.mrb[20].mxu0 }
 0x32f   : > { %v1439_v43 = vpop.f32.mrb[5].mxu1  ;;  %v970_v46 = vmul.f32 %v931_v42, %v1686_v31  ;;  %v1505_v31 = vld [vmem:[%s1851_s3 + $0x90] sm:$0xff]   ;;  %v1197_v42 = vsel %vm1196_vm5, %v1195_v18, 0.0 }
 0x330   : > { %v934_v44 = vpop.f32.mrb[6].mxu1  ;;  %1111 = vmatpush1.bf16.msra.mxu0 %v1505_v31 }
 0x331   : > { %v971_v47 = vmul.f32 %v934_v44, %v1688_v33  ;;  %v1440_v48 = vpop.f32.mrb[7].mxu1  ;;  %1112 = vmatprep.subr.bf16.mxu0 %v1517_v2 }
 0x333   : > { %v980_v50 = vpack.c.bf16 %v971_v47, %v970_v46 }
 0x334   : > { %1113 = vmatpush1.bf16.msra.mxu0 %v1506_v56 }
 0x336   : > { %v939_v51 = vpop.f32.mrb[8].mxu1 }
 0x337   : > { %v1443_v52 = vpop.f32.mrb[9].mxu1  ;;  %v972_v33 = vmul.f32 %v939_v51, %v1674_v25 }
 0x338   : > { %v942_v53 = vpop.f32.mrb[10].mxu1 }
 0x339   : > { %v973_v54 = vmul.f32 %v942_v53, %v1678_v27  ;;  %v1444_v55 = vpop.f32.mrb[11].mxu1 }
 0x33b   : > { %v981_v57 = vpack.c.bf16 %v973_v54, %v972_v33 }
 0x33d   : > { %986 = vrot.lane.b32.xlu1 %v981_v57, %s1518_s15 }
 0x33e   : > { %v947_v58 = vpop.f32.mrb[12].mxu1 }
 0x33f   : > { %v1447_v59 = vpop.f32.mrb[13].mxu1  ;;  %v974_v25 = vmul.f32 %v947_v58, %v1676_v26 }
 0x340   : > { %v950_v60 = vpop.f32.mrb[14].mxu1 }
 0x341   : > { %v975_v27 = vmul.f32 %v950_v60, %v1680_v28  ;;  %v1448_v61 = vpop.f32.mrb[15].mxu1  ;;  %v1433_v28 = vpop.f32.mrb[21].mxu0 }
 0x342   : > { %v877_v11 = vpop.f32.mrb[22].mxu0 }
 0x343   : > { %v982_v62 = vpack.c.bf16 %v975_v27, %v974_v25  ;;  %v1434_v13 = vpop.f32.mrb[23].mxu0 }
 0x345   : > { %989 = vrot.lane.b32.xlu0 %v982_v62, %s1519_s16 }
 0x346   : > { %v955_v2 = vpop.f32.mrb[16].mxu1 }
 0x347   : > { %v1451_v0 = vpop.f32.mrb[17].mxu1  ;;  %v976_v8 = vmul.f32 %v955_v2, %v1682_v29 }
 0x348   : > { %v958_v3 = vpop.f32.mrb[18].mxu1 }
 0x349   : > { %v977_v10 = vmul.f32 %v958_v3, %v1684_v30  ;;  %882 = vperm.xlu0 %1479, %v495_v63   ;;  %v1452_v26 = vpop.f32.mrb[19].mxu1  ;;  %v1201_v3 = vld [vmem:[#allocation2] sm:$0x1] }
 0x34b   : > { %v983_v12 = vpack.c.bf16 %v977_v10, %v976_v8 }
 0x34d   : > { %992 = vrot.lane.b32.xlu1 %v983_v12, %s1520_s17 }
 0x34e   : > { %v963_v15 = vpop.f32.mrb[20].mxu1 }
 0x34f   : > { %v1455_v16 = vpop.f32.mrb[21].mxu1  ;;  %v978_v20 = vmul.f32 %v963_v15, %v1719_v7  ;;  %v1374_v7 = vld [vmem:[%s1852_s4 + $0x1] ss:$0 sm:$0xff] }
 0x350   : > { %v966_v19 = vpop.f32.mrb[22].mxu1 }
 0x351   : > { %v979_v21 = vmul.f32 %v966_v19, %v1717_v5  ;;  %v1456_v22 = vpop.f32.mrb[23].mxu1 }
 0x353   : > { %v984_v23 = vpack.c.bf16 %v979_v21, %v978_v20 }
 0x355   : > { %1385 = vmatprep.mubr.msk.bf16.mxu0 %vm692_vm2, %v984_v23 }
 0x368   : > { %1198 = vadd.xlane.f32.xlu0 %v1197_v42 }
 0x3af   : > { %v987_v29 = vpop.permute.xlu1 %986 }
 0x3b0   : > { %v996_v24 = vsel %vm692_vm2, %v980_v50, %v987_v29  ;;  %v1387_v50 = vld [vmem:[%s1855_s7 + $0x4] sm:$0x7] }
 0x3b7   : > { %v990_v30 = vpop.permute.xlu0 %989 }
 0x3b8   : > { %v998_v32 = vsel %vm696_vm3, %v996_v24, %v990_v30 }
 0x3bf   : > { %v993_v34 = vpop.permute.xlu1 %992 }
 0x3c0   : > { %v1000_v35 = vsel %vm699_vm4, %v998_v32, %v993_v34 }
 0x3c1   : > { %1127 = vmatmul.mubr.bf16.vlgmr.msra.gmra.mrb[24].mxu0 %v1000_v35 }
 0x3c8   : > { %v883_v43 = vpop.permute.xlu0 %882 }
 0x3c9   : > { %v885_v44 = vmul.f32 %v883_v43, %v874_v6 }
 0x3f5   : > { %v1199_v0 = vpop.xlane.xlu0 %1198 }
 0x494   : > { %v1128_v5 = vpop.f32.mrb[24].mxu0 }
 0x495   : > { %v1129_v36 = vadd.f32 %v1374_v7, %v1128_v5  ;;  %v1130_v37 = vpop.f32.mrb[25].mxu0 }
 0x496   : > { %v1131_v38 = vpop.f32.mrb[26].mxu0 }
 0x497   : > { %v1132_v39 = vadd.f32 %v1374_v7, %v1131_v38  ;;  %v1133_v40 = vpop.f32.mrb[27].mxu0  ;;  %v1135_v4 = vmax.f32 %v1129_v36, 0.0 }
 0x499   : > { %v1136_v9 = vmax.f32 %v1132_v39, 0.0 }
 0x49b   : > { %v1137_v14 = vpack.c.bf16 %v1136_v9, %v1135_v4 }
 0x49d   : > { %1458 = vmatpush3.bf16.msra.mxu1 %v1137_v14 }
 0x4a0   : > { %1460 = vmatmul.mubr.msk.bf16.vlgmr.msra.gmra.mrb[24].mxu1 %vm529_vm1, %v1736_v41  ;;  %v887_v41 = vmul.f32 %v886_v45, %v885_v44 }
 0x4a2   : > { %v889_v46 = vsel %vm888_vm6, %v887_v41, 0.0 }
 0x4a3   : > { %v890_v47 = vrot.slane %v889_v46, 4 }
 0x4a5   : > { %v891_v48 = vadd.f32 %v890_v47, %v889_v46 }
 0x4a7   : > { %v892_v54 = vrot.slane %v891_v48, 2 }
 0x4a9   : > { %v893_v58 = vadd.f32 %v892_v54, %v891_v48 }
 0x4ab   : > { %v894_v60 = vrot.slane %v893_v58, 1 }
 0x4ad   : > { %v895_v61 = vadd.f32 %v894_v60, %v893_v58 }
 0x573   : > { %v1172_v49 = vpop.f32.mrb[24].mxu1 }
 0x574   : > { %v1178_v51 = vmul.f32 %v1172_v49, %v883_v43  ;;  %v1461_v52 = vpop.f32.mrb[25].mxu1 }
 0x575   : > { %v1175_v53 = vpop.f32.mrb[26].mxu1 }
 0x576   : > { %v1181_v31 = vmul.f32 %v1387_v50, %v1178_v51  ;;  %v1462_v33 = vpop.f32.mrb[27].mxu1 }
 0x578   : > { %v1182_v55 = vsel %vm888_vm6, %v1181_v31, 0.0 }
 0x579   : > { %v1183_v56 = vrot.slane %v1182_v55, 4 }
 0x57b   : > { %v1184_v57 = vadd.f32 %v1183_v56, %v1182_v55 }
 0x57d   : > { %v1185_v59 = vrot.slane %v1184_v57, 2 }
 0x57f   : > { %v1186_v25 = vadd.f32 %v1185_v59, %v1184_v57 }
 0x581   : > { %v1187_v27 = vrot.slane %v1186_v25, 1 }
 0x583   : > { %v1188_v62 = vadd.f32 %v1187_v27, %v1186_v25 }
 0x585   : > { %v1189_v2 = vadd.f32 %v1188_v62, %v895_v61 }
 0x587   : > { %v1190_v63 = vsel %vm692_vm2, %v1189_v2, 0.0 }
 0x588   : > { %1191 = vadd.xlane.f32.xlu1 %v1190_v63 }
 0x615   : > { %v1192_v6 = vpop.xlane.xlu1 %1191 }
 0x616   : > { %v1200_v8 = vadd.f32 %v1199_v0, %v1192_v6 }
 0x618   : > { %v1202_v10 = vadd.f32 %v1201_v3, %v1200_v8 }
 0x61a   : > { %1205 = vperm.xlu0 %1479, %v1202_v10  }
 0x699   : > { %v1206_v26 = vpop.permute.xlu0 %1205 }
 0x69a   : > { %1208 = vst [vmem:[%s472_s29] sm:$0x1] %v1206_v26 }
 0x69b PF: > { %s23_s19 = sadd.s32 1, %s1513_s19  }
 0x69c   : > { %p20_p4 = scmp.ge.s32.totalorder %s23_s19, 4  }
 0x69e   :  { %22 = sbr.rel (!%p20_p4) target bundleno = 3 (0x3), region = 112 }

</bundles_post_ra>
